<compile_context>
chip_gen: v7x
topology: tpu7x:2x2x1
jax: 0.10.0
libtpu: 0.0.40
codegen_flags: <defaults>
</compile_context>

<pallas_src>
import jax
import jax.numpy as jnp
from jax.experimental import pallas as pl
from jax.experimental.pallas import tpu as pltpu

_HP = jax.lax.Precision.HIGHEST


def mlp_kernel(x_ref, w1_ref, b1_ref, w2_ref, b2_ref, w3_ref, b3_ref, o_ref):
    x = x_ref[...]                                       # [bt, 2]  (batch on sublanes in HBM layout)

    # fc1 + ReLU on the MXU.  Contract the feature axis of BOTH operands so the
    # batch lands on the lane (N) axis without any host/VMEM transpose.
    h1 = jax.lax.dot_general(
        w1_ref[...], x,                                  # [64, 2] . [bt, 2]^T
        dimension_numbers=(((1,), (1,)), ((), ())),
        preferred_element_type=jnp.float32,
        precision=_HP,
    ) + b1_ref[...]                                      # [64, bt]
    h1 = jnp.maximum(h1, 0.0)

    # fc2 + ReLU (MXU), batch stays on lanes.
    h2 = jnp.dot(w2_ref[...], h1,
                 preferred_element_type=jnp.float32,
                 precision=_HP) + b2_ref[...]            # [32, bt]
    h2 = jnp.maximum(h2, 0.0)

    # fc3 (M=1 matmul is free filler on the idle MXU) + sigmoid (EUP exp).
    z = jnp.dot(w3_ref[...], h2,
                preferred_element_type=jnp.float32,
                precision=_HP) + b3_ref[...]             # [1, bt]
    o_ref[...] = (1.0 / (1.0 + jnp.exp(-z))).astype(o_ref.dtype)


def cover_classifier_forward(x, params, *, batch_tile=4096):
    """x: [B, 2] float32 -> [B, 1] float32 sigmoid probabilities."""
    w1, b1, w2, b2, w3, b3 = params
    B, F = x.shape
    assert F == 2, "CoverClassifierNN expects 2 input features"

    lane = 128

    def round_up(v, m):
        return ((v + m - 1) // m) * m

    # Big tile to amortize per-step overhead, but capped near B/2 (rounded to
    # 128 lanes) so the grid has >=2 steps whenever possible -> both v7x
    # TensorCores get work; on v5e/v6e the extra step costs ~0.35 us.
    bt = min(batch_tile, max(lane, round_up(pl.cdiv(B, 2), lane)))
    grid = (pl.cdiv(B, bt),)

    out = pl.pallas_call(
        mlp_kernel,
        out_shape=jax.ShapeDtypeStruct((1, B), jnp.float32),
        grid=grid,
        in_specs=[
            pl.BlockSpec((bt, 2), lambda i: (i, 0)),        # x tile, no host transpose/pad
            pl.BlockSpec(w1.shape, lambda i: (0, 0)),       # w1 [64, 2]   (resident)
            pl.BlockSpec(b1.shape, lambda i: (0, 0)),       # b1 [64, 1]
            pl.BlockSpec(w2.shape, lambda i: (0, 0)),       # w2 [32, 64]
            pl.BlockSpec(b2.shape, lambda i: (0, 0)),       # b2 [32, 1]
            pl.BlockSpec(w3.shape, lambda i: (0, 0)),       # w3 [1, 32]
            pl.BlockSpec(b3.shape, lambda i: (0, 0)),       # b3 [1, 1]
        ],
        out_specs=pl.BlockSpec((1, bt), lambda i: (0, i)),  # lane-dense output tile
        compiler_params=pltpu.CompilerParams(
            dimension_semantics=("parallel",),
            vmem_limit_bytes=32 * 1024 * 1024,
        ),
    )(x, w1, b1, w2, b2, w3, b3)

    # (1, B) -> (B, 1) is a contiguous, no-copy reshape.
    return out.reshape(B, 1)


def init_params(key):
    """PyTorch nn.Linear-style init (uniform +/- 1/sqrt(fan_in)).
    Weights stored [out, in] (PyTorch layout), biases stored as [out, 1] columns."""
    def linear(key, fan_in, fan_out):
        kw, kb = jax.random.split(key)
        bound = 1.0 / jnp.sqrt(fan_in)
        w = jax.random.uniform(kw, (fan_out, fan_in), jnp.float32, -bound, bound)
        b = jax.random.uniform(kb, (fan_out, 1), jnp.float32, -bound, bound)
        return w, b

    k1, k2, k3 = jax.random.split(key, 3)
    w1, b1 = linear(k1, 2, 64)       # [64, 2],  [64, 1]
    w2, b2 = linear(k2, 64, 32)      # [32, 64], [32, 1]
    w3, b3 = linear(k3, 32, 1)       # [1, 32],  [1, 1]
    return (w1, b1, w2, b2, w3, b3)


def reference_forward(x, params):
    """Pure-JAX reference matching torch:
    sigmoid(relu(relu(x W1^T + b1) W2^T + b2) W3^T + b3)."""
    w1, b1, w2, b2, w3, b3 = params
    h = jnp.maximum(jnp.dot(x, w1.T, precision=_HP) + b1[:, 0], 0.0)
    h = jnp.maximum(jnp.dot(h, w2.T, precision=_HP) + b2[:, 0], 0.0)
    z = jnp.dot(h, w3.T, precision=_HP) + b3[:, 0]
    return 1.0 / (1.0 + jnp.exp(-z))


if __name__ == "__main__":
    key = jax.random.PRNGKey(0)
    k_params, k_x = jax.random.split(key)

    params = init_params(k_params)
    B = 256                                  # small demo batch -> bt=128, grid=(2,)
    x = jax.random.normal(k_x, (B, 2), dtype=jnp.float32)

    out = cover_classifier_forward(x, params)
    out = jax.block_until_ready(out)

    ref = reference_forward(x, params)
    assert out.shape == (B, 1)
    assert jnp.allclose(out, ref, atol=1e-5, rtol=1e-5), "mismatch vs reference"

    print("KERNEL_OK")
</pallas_src>

<mosaic_0001>
module attributes {stable_mosaic.version = 11 : i64} {
  func.func @mlp_kernel(%arg0: i32, %arg1: memref<128x2xf32, #tpu.memory_space<vmem>>, %arg2: memref<64x2xf32, #tpu.memory_space<vmem>>, %arg3: memref<64x1xf32, #tpu.memory_space<vmem>>, %arg4: memref<32x64xf32, #tpu.memory_space<vmem>>, %arg5: memref<32x1xf32, #tpu.memory_space<vmem>>, %arg6: memref<1x32xf32, #tpu.memory_space<vmem>>, %arg7: memref<1x1xf32, #tpu.memory_space<vmem>>, %arg8: memref<1x128xf32, #tpu.memory_space<vmem>>) attributes {dimension_semantics = [#tpu.dimension_semantics<parallel>], iteration_bounds = array<i64: 2>, scalar_prefetch = 0 : i64, scratch_operands = 0 : i64, tpu.core_type = #tpu.core_type<tc>, window_params = [{transform_indices = @transform_0, window_bounds = array<i64: 128, 2>}, {pipeline_mode = #tpu.pipeline_mode<synchronous>, transform_indices = @transform_1, window_bounds = array<i64: 64, 2>}, {pipeline_mode = #tpu.pipeline_mode<synchronous>, transform_indices = @transform_2, window_bounds = array<i64: 64, 1>}, {pipeline_mode = #tpu.pipeline_mode<synchronous>, transform_indices = @transform_3, window_bounds = array<i64: 32, 64>}, {pipeline_mode = #tpu.pipeline_mode<synchronous>, transform_indices = @transform_4, window_bounds = array<i64: 32, 1>}, {pipeline_mode = #tpu.pipeline_mode<synchronous>, transform_indices = @transform_5, window_bounds = array<i64: 1, 32>}, {pipeline_mode = #tpu.pipeline_mode<synchronous>, transform_indices = @transform_6, window_bounds = array<i64: 1, 1>}, {transform_indices = @transform_7, window_bounds = array<i64: 1, 128>}]} {
    %c0 = arith.constant 0 : index
    %c0_0 = arith.constant 0 : index
    %0 = vector.load %arg1[%c0, %c0_0] : memref<128x2xf32, #tpu.memory_space<vmem>>, vector<128x2xf32>
    %c0_1 = arith.constant 0 : index
    %c0_2 = arith.constant 0 : index
    %1 = vector.load %arg2[%c0_1, %c0_2] : memref<64x2xf32, #tpu.memory_space<vmem>>, vector<64x2xf32>
    %cst = arith.constant dense<0.000000e+00> : vector<64x128xf32>
    %2 = tpu.matmul %1, %0, %cst {dimension_numbers = #tpu.dot_dimension_numbers<[1], [1], [0], [0], [0, 0, 1, 0], [], []>, precision = #tpu.contract_precision<fp32>} : vector<64x2xf32>, vector<128x2xf32>, vector<64x128xf32> -> vector<64x128xf32>
    %c0_3 = arith.constant 0 : index
    %c0_4 = arith.constant 0 : index
    %3 = vector.load %arg3[%c0_3, %c0_4] : memref<64x1xf32, #tpu.memory_space<vmem>>, vector<64x1xf32>
    %4 = vector.broadcast %3 : vector<64x1xf32> to vector<64x128xf32>
    %5 = arith.addf %2, %4 : vector<64x128xf32>
    %cst_5 = arith.constant 0.000000e+00 : f32
    %6 = vector.broadcast %cst_5 : f32 to vector<64x128xf32>
    %7 = arith.maximumf %5, %6 : vector<64x128xf32>
    %c0_6 = arith.constant 0 : index
    %c0_7 = arith.constant 0 : index
    %8 = vector.load %arg4[%c0_6, %c0_7] : memref<32x64xf32, #tpu.memory_space<vmem>>, vector<32x64xf32>
    %cst_8 = arith.constant dense<0.000000e+00> : vector<32x128xf32>
    %9 = tpu.matmul %8, %7, %cst_8 {dimension_numbers = #tpu.dot_dimension_numbers<[1], [0], [0], [1], [0, 0, 1, 1], [], []>, precision = #tpu.contract_precision<fp32>} : vector<32x64xf32>, vector<64x128xf32>, vector<32x128xf32> -> vector<32x128xf32>
    %c0_9 = arith.constant 0 : index
    %c0_10 = arith.constant 0 : index
    %10 = vector.load %arg5[%c0_9, %c0_10] : memref<32x1xf32, #tpu.memory_space<vmem>>, vector<32x1xf32>
    %11 = vector.broadcast %10 : vector<32x1xf32> to vector<32x128xf32>
    %12 = arith.addf %9, %11 : vector<32x128xf32>
    %cst_11 = arith.constant 0.000000e+00 : f32
    %13 = vector.broadcast %cst_11 : f32 to vector<32x128xf32>
    %14 = arith.maximumf %12, %13 : vector<32x128xf32>
    %c0_12 = arith.constant 0 : index
    %c0_13 = arith.constant 0 : index
    %15 = vector.load %arg6[%c0_12, %c0_13] : memref<1x32xf32, #tpu.memory_space<vmem>>, vector<1x32xf32>
    %cst_14 = arith.constant dense<0.000000e+00> : vector<1x128xf32>
    %16 = tpu.matmul %15, %14, %cst_14 {dimension_numbers = #tpu.dot_dimension_numbers<[1], [0], [0], [1], [0, 0, 1, 1], [], []>, precision = #tpu.contract_precision<fp32>} : vector<1x32xf32>, vector<32x128xf32>, vector<1x128xf32> -> vector<1x128xf32>
    %c0_15 = arith.constant 0 : index
    %c0_16 = arith.constant 0 : index
    %17 = vector.load %arg7[%c0_15, %c0_16] : memref<1x1xf32, #tpu.memory_space<vmem>>, vector<1x1xf32>
    %18 = vector.broadcast %17 : vector<1x1xf32> to vector<1x128xf32>
    %19 = arith.addf %16, %18 : vector<1x128xf32>
    %cst_17 = arith.constant 0.000000e+00 : f32
    %20 = vector.broadcast %cst_17 : f32 to vector<1x128xf32>
    %21 = arith.subf %20, %19 : vector<1x128xf32>
    %22 = math.exp %21 : vector<1x128xf32>
    %cst_18 = arith.constant 1.000000e+00 : f32
    %23 = vector.broadcast %cst_18 : f32 to vector<1x128xf32>
    %24 = arith.addf %23, %22 : vector<1x128xf32>
    %cst_19 = arith.constant 1.000000e+00 : f32
    %25 = vector.broadcast %cst_19 : f32 to vector<1x128xf32>
    %26 = arith.divf %25, %24 : vector<1x128xf32>
    %c0_20 = arith.constant 0 : index
    %c0_21 = arith.constant 0 : index
    %27 = vector.load %arg8[%c0_20, %c0_21] : memref<1x128xf32, #tpu.memory_space<vmem>>, vector<1x128xf32>
    tpu.vector_store %arg8[%c0_20, %c0_21], %26 {strides = array<i32>} : memref<1x128xf32, #tpu.memory_space<vmem>>, vector<1x128xf32>,
    return
  }
  func.func @transform_0(%arg0: i32) -> (i32, i32) {
    %c0_i32 = arith.constant 0 : i32
    %c0_i32_0 = arith.constant 0 : i32
    return %arg0, %c0_i32 : i32, i32
  }
  func.func @transform_1(%arg0: i32) -> (i32, i32) {
    %c0_i32 = arith.constant 0 : i32
    %c0_i32_0 = arith.constant 0 : i32
    %c0_i32_1 = arith.constant 0 : i32
    return %c0_i32, %c0_i32_0 : i32, i32
  }
  func.func @transform_2(%arg0: i32) -> (i32, i32) {
    %c0_i32 = arith.constant 0 : i32
    %c0_i32_0 = arith.constant 0 : i32
    %c0_i32_1 = arith.constant 0 : i32
    return %c0_i32, %c0_i32_0 : i32, i32
  }
  func.func @transform_3(%arg0: i32) -> (i32, i32) {
    %c0_i32 = arith.constant 0 : i32
    %c0_i32_0 = arith.constant 0 : i32
    %c0_i32_1 = arith.constant 0 : i32
    return %c0_i32, %c0_i32_0 : i32, i32
  }
  func.func @transform_4(%arg0: i32) -> (i32, i32) {
    %c0_i32 = arith.constant 0 : i32
    %c0_i32_0 = arith.constant 0 : i32
    %c0_i32_1 = arith.constant 0 : i32
    return %c0_i32, %c0_i32_0 : i32, i32
  }
  func.func @transform_5(%arg0: i32) -> (i32, i32) {
    %c0_i32 = arith.constant 0 : i32
    %c0_i32_0 = arith.constant 0 : i32
    %c0_i32_1 = arith.constant 0 : i32
    return %c0_i32, %c0_i32_0 : i32, i32
  }
  func.func @transform_6(%arg0: i32) -> (i32, i32) {
    %c0_i32 = arith.constant 0 : i32
    %c0_i32_0 = arith.constant 0 : i32
    %c0_i32_1 = arith.constant 0 : i32
    return %c0_i32, %c0_i32_0 : i32, i32
  }
  func.func @transform_7(%arg0: i32) -> (i32, i32) {
    %c0_i32 = arith.constant 0 : i32
    %c0_i32_0 = arith.constant 0 : i32
    return %c0_i32, %arg0 : i32, i32
  }
}

</mosaic_0001>

<bundles_post_ra>
// kernel: tpu_custom_call.1
= control target key start
LH: loop header
LB: loop body
LE: loop exit
PB: predicated region body
PF: predicated region fallthrough
CT: control target
= control target key end

     0   :  { %s4675_s0 = inlined_call_operand.vmem [shape: f32[256,2], index: 0, kind: input, shape index: {}]   ;;  %s4676_s1 = inlined_call_operand.vmem [shape: f32[64,2], index: 1, kind: input, shape index: {}]   ;;  %s4677_s2 = inlined_call_operand.vmem [shape: f32[64,1], index: 2, kind: input, shape index: {}]   ;;  %s4678_s3 = inlined_call_operand.vmem [shape: f32[32,64], index: 3, kind: input, shape index: {}]   ;;  %s4679_s4 = inlined_call_operand.vmem [shape: f32[32,1], index: 4, kind: input, shape index: {}]   ;;  %s4680_s5 = inlined_call_operand.vmem [shape: f32[1,32], index: 5, kind: input, shape index: {}]   ;;  %s4681_s6 = inlined_call_operand.<no memory space> [shape: f32[1,1], index: 6, kind: input, shape index: {}]   ;;  %s4682_s7 = inlined_call_operand.hbm [shape: f32[1,256], index: 7, kind: output, shape index: {}]  }
   0x1   :  { %v12_v0 = vstv %s4681_s6 }
   0x2   :  { %13 = vst [vmem:[#allocation2] sm:$0x1] %v12_v0 }
   0x3   :  { %14 = vsyncpa [#allocation4], 0 }
   0x4   :  { %16 = vsyncpa [#allocation4 + $0x1], 0  ;;  %s3946_s26 = smov 0   ;;  %s3948_s27 = smov 0  }
   0x5   :  { %s3950_s28 = smov 0   ;;  %s3952_s29 = smov 0  }
   0x6 LB: > { %s2660_s6 = sadd.s32 4294967295, %s3896_s29   ;;  %s2661_s30 = sadd.s32 4294967294, %s3896_s29   ;;  %s3896_s29 = sphi %s3952_s29, %s4714_s29   ;;  %s3892_s28 = sphi %s3950_s28, %s4713_s28   ;;  %s3888_s27 = sphi %s3948_s27, %s4712_s27   ;;  %s3884_s26 = sphi %s3946_s26, %s4711_s26  }
   0x7   : > { %s3969_s8 = sadd.s32 1, %s3896_s29   ;;  %s181_s9 = sadd.s32 1, %s3892_s28 }
   0x8   : > { %s178_s10 = ssub.s32 %s3896_s29, %s3969_s8  ;;  %p191_p0 = scmp.ne.s32.totalorder %s3892_s28, %s3888_s27 }
   0x9   : > { %p179_p1 = scmp.eq.s32.totalorder %s178_s10, 0  ;;  %p192_p2 = scmp.eq.s32.totalorder %s2660_s6, 1 }
   0xa   : > { %p197_p3 = scmp.ne.s32.totalorder %s3888_s27, %s3884_s26  ;;  %p198_p4 = scmp.eq.s32.totalorder %s2661_s30, 1 }
   0xb   : > { %s3979_s11 = scalar_select %p179_p1, %s3892_s28, %s181_s9  }
   0xc   : > { %p3981_p5 = por %p192_p2, %p191_p0  ;;  %p3985_p6 = por %p198_p4, %p197_p3 }
   0xd   : > { %p2664_p7 = scmp.ge.s32.totalorder %s3896_s29, 1  ;;  %p243_p8 = scmp.lt.s32.totalorder %s3896_s29, 3 }
   0xf   : > { %p244_p9 = pnand %p2664_p7, %p243_p8 }
  0x10   : > { %s3991_s14 = sshll.u32 (!%p244_p9), %s2660_s6, 4  ;;  %vm352_vm0 = vcmask (!%p244_p9), 15360   ;;  %v296_v1 = vld [vmem:[%s4676_s1] sm:$0xff] (!%p244_p9)  ;;  %vm1403_vm1 = vcmask (!%p244_p9), 523264   ;;  %vm3900_vm2 = vmmov (!%p244_p9), 0   ;;  %vm2097_vm3 = vcmask (!%p244_p9), 261120  }
  0x11   : > { %247 = sbr.rel (%p244_p9) target bundleno = 1133 (0x46d), region = 48  ;;  %p275_p10 = scmp.lt.s32.totalorder (!%p244_p9), %s3991_s14, 31  ;;  %v354_v2 = vsel (!%p244_p9), %vm352_vm0, %v296_v1, 0 }
  0x12   : > { %v3998_v3 = vand.u32 (!%p244_p9), 4294901760, %v354_v2  ;;  %s272_s25 = sand.u32 (!%p244_p9), 1, %s3888_s27   ;;  %s4633_s15 = scalar_lea.hbm (!%p244_p9), %s4682_s7, %s3991_s14 }
  0x13   : > { %s273_s6 = scalar_lea.vmem (!%p244_p9), [#allocation3], %s272_s25  ;;  %s2594_s16 = scalar_lea.sflag (!%p244_p9), [#allocation4], %s272_s25 }
  0x14   : > { %v4002_v4 = vsub.f32 (!%p244_p9), %v354_v2, %v3998_v3  ;;  %s2606_s30 = sshll.u32 (!%p244_p9), %s273_s6, 4  ;;  %s4635_s30 = int_to_ptr.vmem [resolvable:$true] %s2606_s30 }
  0x16   : > { %3036 = vmatprep.mubr.f32.mxu0 (!%p244_p9), %v4002_v4  ;;  %v4689_v38 = vand.u32 (!%p244_p9), 4294901760, %v4002_v4 }
  0x18   : > { %s276_s17 = scalar_select %p275_p10, %s3991_s14, 31  ;;  %v509_v44 = vsub.f32 %v4002_v4, %v4689_v38 }
  0x1a   : > { %s2666_s18 = sshll.u32 %s276_s17, 3  ;;  %v510_v49 = vand.u32 4294901760, %v509_v44  ;;  %s3834_s17 = scalar_lea.vmem %s4635_s30, 16 }
  0x1b   : > { %s4007_s21 = scalar_lea.vmem %s4675_s0, %s2666_s18  ;;  %p3835_p11 = scmp.ne.s32.totalorder %s4635_s30, %s3834_s17 }
  0x1c   : > { %v280_v5 = vld [vmem:[%s4007_s21] sm:$0xff]  ;;  %v281_v6 = vld [vmem:[%s4007_s21 + $0x8] sm:$0xff]  ;;  %v282_v7 = vld [vmem:[%s4007_s21 + $0x10] sm:$0xff]  ;;  %2948 = vmatprep.mubr.f32.mxu1 %v510_v49  ;;  %s3902_s18 = smov [#allocation3]  }
  0x1d   : > { %v378_v8 = vsel %vm352_vm0, %v280_v5, 0  ;;  %v381_v9 = vsel %vm352_vm0, %v281_v6, 0  ;;  %v283_v10 = vld [vmem:[%s4007_s21 + $0x18] sm:$0xff]  ;;  %v384_v11 = vsel %vm352_vm0, %v282_v7, 0  ;;  %v284_v12 = vld [vmem:[%s4007_s21 + $0x20] sm:$0xff]  ;;  %v285_v13 = vld [vmem:[%s4007_s21 + $0x28] sm:$0xff]  ;;  %p3836_p12 = pnand %p3835_p11, %p3981_p5 }
  0x1e   : > { %v426_v14 = vand.u32 4294901760, %v378_v8  ;;  %v429_v15 = vand.u32 4294901760, %v381_v9  ;;  %v387_v16 = vsel %vm352_vm0, %v283_v10, 0  ;;  %v432_v17 = vand.u32 4294901760, %v384_v11  ;;  %v286_v31 = vld [vmem:[%s4007_s21 + $0x30] sm:$0xff]  ;;  %v287_v32 = vld [vmem:[%s4007_s21 + $0x38] sm:$0xff] }
  0x1f   : > { %v435_v18 = vand.u32 4294901760, %v387_v16  ;;  %v390_v19 = vsel %vm352_vm0, %v284_v12, 0  ;;  %v393_v20 = vsel %vm352_vm0, %v285_v13, 0  ;;  %v396_v35 = vsel %vm352_vm0, %v286_v31, 0  ;;  %v288_v42 = vld [vmem:[%s4007_s21 + $0x40] sm:$0xff]  ;;  %v289_v43 = vld [vmem:[%s4007_s21 + $0x48] sm:$0xff]  ;;  %p3837_p13 = pneg %p3836_p12 }
  0x20   : > { %v4022_v21 = vpack.c.bf16 %v429_v15, %v426_v14  ;;  %v4024_v22 = vsub.f32 %v378_v8, %v426_v14  ;;  %v4026_v23 = vsub.f32 %v381_v9, %v429_v15  ;;  %v4028_v24 = vsub.f32 %v384_v11, %v432_v17  ;;  %v290_v63 = vld [vmem:[%s4007_s21 + $0x50] sm:$0xff]  ;;  %v291_v0 = vld [vmem:[%s4007_s21 + $0x58] sm:$0xff]  ;;  %s3838_s19 = sshll.u32 %s3902_s18, 4  ;;  %s3839_s19 = int_to_ptr.vmem [resolvable:$false] %s3838_s19 }
  0x21   : > { %v4030_v25 = vpack.c.bf16 %v435_v18, %v432_v17  ;;  %v4032_v26 = vsub.f32 %v387_v16, %v435_v18  ;;  %v438_v28 = vand.u32 4294901760, %v390_v19  ;;  %v441_v29 = vand.u32 4294901760, %v393_v20  ;;  %v292_v16 = vld [vmem:[%s4007_s21 + $0x60] sm:$0xff]  ;;  %v293_v17 = vld [vmem:[%s4007_s21 + $0x68] sm:$0xff]  ;;  %s3840_s20 = scalar_lea.vmem %s3839_s19, 32  ;;  %p3841_p0 = scmp.lt.s32.totalorder %s4635_s30, %s3839_s19 }
  0x22   : > { %v3442_v27 = vpack.c.bf16 %v4026_v23, %v4024_v22  ;;  %3379 = vmatprep.subr.bf16.mxu1 %v4022_v21  ;;  %v399_v36 = vsel %vm352_vm0, %v287_v32, 0  ;;  %v444_v40 = vand.u32 4294901760, %v396_v35  ;;  %v589_v45 = vand.u32 4294901760, %v4024_v22  ;;  %p3842_p1 = scmp.lt.s32.totalorder %s3840_s20, %s3834_s17 }
  0x23   : > { %v3446_v30 = vpack.c.bf16 %v4032_v26, %v4028_v24  ;;  %3381 = vmatpush3.bf16.xpose.msra.mxu1 %v4022_v21  ;;  %v4043_v33 = vsub.f32 %v390_v19, %v438_v28  ;;  %v4045_v34 = vsub.f32 %v393_v20, %v441_v29  ;;  %v4049_v37 = vpack.c.bf16 %v441_v29, %v438_v28 }
  0x24   : > { %3443 = vmatprep.subr.bf16.mxu0 %v3442_v27  ;;  %3383 = vmatprep.subr.bf16.mxu1 %v4030_v25  ;;  %v447_v41 = vand.u32 4294901760, %v399_v36  ;;  %v596_v46 = vand.u32 4294901760, %v4026_v23  ;;  %v4063_v47 = vsub.f32 %v396_v35, %v444_v40  ;;  %v402_v50 = vsel %vm352_vm0, %v288_v42, 0  ;;  %p3843_p2 = por %p3842_p1, %p3841_p0 }
  0x25   : > { %3445 = vmatpush3.bf16.xpose.msra.mxu0 %v3442_v27  ;;  %v3450_v39 = vpack.c.bf16 %v4045_v34, %v4043_v33  ;;  %v405_v51 = vsel %vm352_vm0, %v289_v43, 0  ;;  %v603_v54 = vand.u32 4294901760, %v4028_v24  ;;  %v610_v55 = vand.u32 4294901760, %v4032_v26 }
  0x26   : > { %3447 = vmatprep.subr.bf16.mxu0 %v3446_v30  ;;  %v4065_v48 = vsub.f32 %v399_v36, %v447_v41  ;;  %v4073_v52 = vpack.c.bf16 %v596_v46, %v589_v45  ;;  %v4075_v53 = vpack.c.bf16 %v447_v41, %v444_v40  ;;  %v617_v56 = vand.u32 4294901760, %v4043_v33  ;;  %v295_v40 = vld [vmem:[%s4007_s21 + $0x78] sm:$0xff]  ;;  %p3844_p3 = pnand %p3843_p2, %p3837_p13 }
  0x27   : > { %v624_v57 = vand.u32 4294901760, %v4045_v34  ;;  %v450_v59 = vand.u32 4294901760, %v402_v50  ;;  %v453_v60 = vand.u32 4294901760, %v405_v51  ;;  %v4087_v61 = vpack.c.bf16 %v610_v55, %v603_v54 }
  0x28   : > { %v3454_v58 = vpack.c.bf16 %v4065_v48, %v4063_v47  ;;  %v631_v1 = vand.u32 4294901760, %v4063_v47  ;;  %v638_v2 = vand.u32 4294901760, %v4065_v48  ;;  %v408_v8 = vsel %vm352_vm0, %v290_v63, 0  ;;  %v298_v63 = vld [vmem:[%s4676_s1 + $0x10] sm:$0xff] }
  0x29   : > { %v4094_v62 = vpack.c.bf16 %v624_v57, %v617_v56  ;;  %v4101_v5 = vsub.f32 %v402_v50, %v450_v59  ;;  %v4103_v6 = vsub.f32 %v405_v51, %v453_v60  ;;  %v411_v9 = vsel %vm352_vm0, %v291_v0, 0  ;;  %v297_v51 = vld [vmem:[%s4676_s1 + $0x8] sm:$0xff] }
  0x2a   : > { %v4109_v7 = vpack.c.bf16 %v638_v2, %v631_v1  ;;  %v4113_v10 = vpack.c.bf16 %v453_v60, %v450_v59  ;;  %v456_v12 = vand.u32 4294901760, %v408_v8  ;;  %v459_v13 = vand.u32 4294901760, %v411_v9 }
  0x2b   : > { %3385 = vmatpush3.bf16.xpose.msra.mxu1 %v4030_v25  ;;  %v3458_v11 = vpack.c.bf16 %v4103_v6, %v4101_v5  ;;  %v4693_v14 = vand.u32 4294901760, %v4101_v5  ;;  %v4692_v15 = vand.u32 4294901760, %v4103_v6  ;;  %v414_v27 = vsel %vm352_vm0, %v292_v16, 0 }
  0x2c   : > { %3387 = vmatprep.subr.bf16.mxu1 %v4049_v37  ;;  %v4129_v19 = vsub.f32 %v408_v8, %v456_v12  ;;  %v4131_v20 = vsub.f32 %v411_v9, %v459_v13  ;;  %v417_v28 = vsel %vm352_vm0, %v293_v17, 0  ;;  %v4135_v29 = vpack.c.bf16 %v459_v13, %v456_v12 }
  0x2d   : > { %3449 = vmatpush3.bf16.xpose.msra.mxu0 %v3446_v30  ;;  %v4127_v18 = vpack.c.bf16 %v4692_v15, %v4693_v14  ;;  %v462_v31 = vand.u32 4294901760, %v414_v27  ;;  %v465_v32 = vand.u32 4294901760, %v417_v28  ;;  %v423_v49 = vsel %vm352_vm0, %v295_v40, 0 }
  0x2e   : > { %3451 = vmatprep.subr.bf16.mxu0 %v3450_v39  ;;  %v3462_v30 = vpack.c.bf16 %v4131_v20, %v4129_v19  ;;  %v4688_v35 = vand.u32 4294901760, %v4129_v19  ;;  %v4685_v36 = vand.u32 4294901760, %v4131_v20  ;;  %v471_v60 = vand.u32 4294901760, %v423_v49 }
  0x2f   : > { %v4151_v42 = vsub.f32 %v414_v27, %v462_v31  ;;  %v4153_v43 = vsub.f32 %v417_v28, %v465_v32  ;;  %v4157_v50 = vpack.c.bf16 %v465_v32, %v462_v31  ;;  %v357_v9 = vsel %vm352_vm0, %v297_v51, 0  ;;  %v300_v28 = vld [vmem:[%s4676_s1 + $0x20] sm:$0xff]  ;;  %v301_v51 = vld [vmem:[%s4676_s1 + $0x28] sm:$0xff] }
  0x30   : > { %v4149_v41 = vpack.c.bf16 %v4685_v36, %v4688_v35  ;;  %v4183_v16 = vsub.f32 %v423_v49, %v471_v60  ;;  %v360_v17 = vsel %vm352_vm0, %v298_v63, 0  ;;  %v4186_v27 = vand.u32 4294901760, %v357_v9 }
  0x31   : > { %v4684_v0 = vand.u32 4294901760, %v4151_v42  ;;  %v4683_v8 = vand.u32 4294901760, %v4153_v43  ;;  %v590_v32 = vsub.f32 %v4024_v22, %v589_v45  ;;  %v4200_v40 = vand.u32 4294901760, %v360_v17  ;;  %v302_v22 = vld [vmem:[%s4676_s1 + $0x30] sm:$0xff] }
  0x32   : > { %v366_v49 = vsel %vm352_vm0, %v300_v28, 0  ;;  %v4686_v45 = vand.u32 4294901760, %v4183_v16 }
  0x33   : > { %3389 = vmatpush3.bf16.xpose.msra.mxu1 %v4049_v37  ;;  %v4179_v12 = vpack.c.bf16 %v4683_v8, %v4684_v0  ;;  %v4223_v28 = vand.u32 4294901760, %v366_v49  ;;  %v369_v8 = vsel %vm352_vm0, %v301_v51, 0 }
  0x34   : > { %3391 = vmatprep.subr.bf16.mxu1 %v4075_v53  ;;  %v4241_v51 = vand.u32 4294901760, %v369_v8 }
  0x35   : > { %3453 = vmatpush3.bf16.xpose.msra.mxu0 %v3450_v39  ;;  %v294_v39 = vld [vmem:[%s4007_s21 + $0x70] sm:$0xff] }
  0x36   : > { %3455 = vmatprep.subr.bf16.mxu0 %v3454_v58  ;;  %v420_v44 = vsel %vm352_vm0, %v294_v39, 0  ;;  %v597_v39 = vsub.f32 %v4026_v23, %v596_v46  ;;  %v4217_v46 = vsub.f32 %v357_v9, %v4186_v27  ;;  %v372_v9 = vsel %vm352_vm0, %v302_v22, 0 }
  0x37   : > { %v468_v59 = vand.u32 4294901760, %v420_v44  ;;  %v611_v22 = vsub.f32 %v4032_v26, %v610_v55  ;;  %v4252_v35 = vand.u32 4294901760, %v372_v9 }
  0x38   : > { %v598_v63 = vand.u32 4294901760, %v597_v39 }
  0x39   : > { %v4181_v13 = vsub.f32 %v420_v44, %v468_v59 }
  0x3b   : > { %3393 = vmatpush3.bf16.xpose.msra.mxu1 %v4075_v53  ;;  %v3470_v44 = vpack.c.bf16 %v4183_v16, %v4181_v13  ;;  %v4687_v23 = vand.u32 4294901760, %v4181_v13 }
  0x3c   : > { %3395 = vmatprep.subr.bf16.mxu1 %v4113_v10 }
  0x3d   : > { %3457 = vmatpush3.bf16.xpose.msra.mxu0 %v3454_v58  ;;  %v3466_v58 = vpack.c.bf16 %v4153_v43, %v4151_v42  ;;  %v4230_v0 = vpack.c.bf16 %v4686_v45, %v4687_v23  ;;  %v604_v45 = vsub.f32 %v4028_v24, %v603_v54  ;;  %v4250_v23 = vsub.f32 %v366_v49, %v4223_v28 }
  0x3e   : > { %3459 = vmatprep.subr.bf16.mxu0 %v3458_v11  ;;  %v4265_v54 = vsub.f32 %v369_v8, %v4241_v51 }
  0x3f   : > { %v4694_v26 = vand.u32 4294901760, %v4250_v23  ;;  %v605_v49 = vand.u32 4294901760, %v604_v45 }
  0x40   : > { %v558_v15 = vand.u32 4294901760, %v4265_v54 }
  0x41   : > { %v549_v14 = vsub.f32 %v4250_v23, %v4694_v26 }
  0x42   : > { %v559_v26 = vsub.f32 %v4265_v54, %v558_v15 }
  0x43   : > { %3397 = vmatpush3.bf16.xpose.msra.mxu1 %v4113_v10 }
  0x44   : > { %3399 = vmatprep.subr.bf16.mxu1 %v4135_v29 }
  0x45   : > { %3461 = vmatpush3.bf16.xpose.msra.mxu0 %v3458_v11  ;;  %v299_v11 = vld [vmem:[%s4676_s1 + $0x18] sm:$0xff] }
  0x46   : > { %3463 = vmatprep.subr.bf16.mxu0 %v3462_v30  ;;  %v363_v31 = vsel %vm352_vm0, %v299_v11, 0  ;;  %v4221_v11 = vsub.f32 %v360_v17, %v4200_v40  ;;  %v4690_v17 = vand.u32 4294901760, %v4217_v46 }
  0x48   : > { %v4691_v39 = vand.u32 4294901760, %v4221_v11  ;;  %v519_v38 = vsub.f32 %v4217_v46, %v4690_v17 }
  0x4a   : > { %v529_v24 = vsub.f32 %v4221_v11, %v4691_v39  ;;  %v520_v17 = vand.u32 4294901760, %v519_v38  ;;  %v618_v38 = vsub.f32 %v4043_v33, %v617_v56  ;;  %v560_v56 = vand.u32 4294901760, %v559_v26 }
  0x4b   : > { %3401 = vmatpush3.bf16.xpose.msra.mxu1 %v4135_v29 }
  0x4c   : > { %3403 = vmatprep.subr.bf16.mxu1 %v4157_v50  ;;  %v530_v8 = vand.u32 4294901760, %v529_v24  ;;  %v619_v33 = vand.u32 4294901760, %v618_v38  ;;  %v4700_v38 = vand.u32 4294901760, %v4002_v4 }
  0x4d   : > { %3465 = vmatpush3.bf16.xpose.msra.mxu0 %v3462_v30  ;;  %v4191_v30 = vpack.c.bf16 %v471_v60, %v468_v59  ;;  %v4209_v59 = vand.u32 4294901760, %v363_v31  ;;  %v591_v60 = vand.u32 4294901760, %v590_v32 }
  0x4e   : > { %3467 = vmatprep.subr.bf16.mxu0 %v3466_v58 }
  0x4f   : > { %v4238_v32 = vsub.f32 %v363_v31, %v4209_v59  ;;  %v3410_v36 = vpack.c.bf16 %v598_v63, %v591_v60  ;;  %v612_v63 = vand.u32 4294901760, %v611_v22  ;;  %v625_v22 = vsub.f32 %v4045_v34, %v624_v57 }
  0x51   : > { %v4695_v60 = vand.u32 4294901760, %v4238_v32  ;;  %v626_v34 = vand.u32 4294901760, %v625_v22 }
  0x53   : > { %3405 = vmatpush3.bf16.xpose.msra.mxu1 %v4157_v50  ;;  %v539_v39 = vsub.f32 %v4238_v32, %v4695_v60 }
  0x54   : > { %3407 = vmatprep.subr.bf16.mxu1 %v4191_v30 }
  0x55   : > { %3469 = vmatpush3.bf16.xpose.msra.mxu0 %v3466_v58  ;;  %v303_v58 = vld [vmem:[%s4676_s1 + $0x38] sm:$0xff]  ;;  %v540_v24 = vand.u32 4294901760, %v539_v39  ;;  %v639_v39 = vsub.f32 %v4065_v48, %v638_v2  ;;  %v4698_v48 = vand.u32 4294901760, %v4101_v5  ;;  %v4699_v2 = vand.u32 4294901760, %v4103_v6 }
  0x56   : > { %3471 = vmatprep.subr.bf16.mxu0 %v3470_v44  ;;  %v375_v31 = vsel %vm352_vm0, %v303_v58, 0  ;;  %v4270_v58 = vsub.f32 %v372_v9, %v4252_v35  ;;  %v3414_v9 = vpack.c.bf16 %v612_v63, %v605_v49 }
  0x57   : > { %v4267_v55 = vand.u32 4294901760, %v375_v31 }
  0x58   : > { %v568_v45 = vand.u32 4294901760, %v4270_v58 }
  0x5a   : > { %v569_v49 = vsub.f32 %v4270_v58, %v568_v45 }
  0x5b   : > { %3409 = vmatpush3.bf16.xpose.msra.mxu1 %v4191_v30 }
  0x5c   : > { %3411 = vmatprep.subr.bf16.mxu1 %v3410_v36 }
  0x5d   : > { %3473 = vmatpush3.bf16.xpose.msra.mxu0 %v3470_v44  ;;  %v4282_v44 = vsub.f32 %v375_v31, %v4267_v55  ;;  %v550_v31 = vand.u32 4294901760, %v549_v14  ;;  %v570_v14 = vand.u32 4294901760, %v569_v49  ;;  %v4701_v49 = vand.u32 4294901760, %v4129_v19 }
  0x5e   : > { %3475 = vmatprep.subr.bf16.mxu0 %v4022_v21 }
  0x5f   : > { %v578_v60 = vand.u32 4294901760, %v4282_v44 }
  0x61   : > { %v579_v57 = vsub.f32 %v4282_v44, %v578_v60 }
  0x62   : > { %2949 = vmatmul.mubr.f32.vlgmr.msra.gmra.mrb[0].mxu1 %v520_v17  ;;  %v632_v17 = vsub.f32 %v4063_v47, %v631_v1  ;;  %v646_v1 = vsub.f32 %v4101_v5, %v4698_v48  ;;  %v660_v5 = vsub.f32 %v4129_v19, %v4701_v49 }
  0x63   : > { %3413 = vmatpush3.bf16.xpose.msra.mxu1 %v3410_v36  ;;  %2951 = vmatprep.mubr.f32.mxu1 %v530_v8  ;;  %v3418_v36 = vpack.c.bf16 %v626_v34, %v619_v33  ;;  %v580_v26 = vand.u32 4294901760, %v579_v57  ;;  %v640_v8 = vand.u32 4294901760, %v639_v39  ;;  %v4702_v33 = vand.u32 4294901760, %v4131_v20 }
  0x64   : > { %3037 = vmatmul.mubr.f32.vlgmr.msra.gmra.mrb[0].mxu0 %v4217_v46  ;;  %3415 = vmatprep.subr.bf16.mxu1 %v3414_v9  ;;  %v633_v63 = vand.u32 4294901760, %v632_v17  ;;  %v647_v22 = vand.u32 4294901760, %v646_v1  ;;  %v661_v4 = vand.u32 4294901760, %v660_v5  ;;  %v4703_v57 = vand.u32 4294901760, %v4151_v42 }
  0x65   : > { %3477 = vmatpush3.bf16.xpose.msra.mxu0 %v4022_v21  ;;  %3039 = vmatprep.mubr.f32.mxu0 %v4221_v11  ;;  %v4709_v1 = vand.u32 4294901760, %v4238_v32 }
  0x66   : > { %3479 = vmatprep.subr.bf16.mxu0 %v4030_v25  ;;  %2952 = vmatmul.mubr.f32.gmra.mrb[2].mxu1 %v540_v24  ;;  %v3422_v47 = vpack.c.bf16 %v640_v8, %v633_v63  ;;  %v4706_v8 = vand.u32 4294901760, %v4183_v16 }
  0x67   : > { %2954 = vmatprep.mubr.f32.mxu1 %v550_v31 }
  0x68   : > { %3040 = vmatmul.mubr.f32.gmra.mrb[2].mxu0 %v4238_v32  ;;  %v309_v32 = vld [vmem:[%s4677_s2 + $0x28] sm:$0xff] }
  0x69   : > { %3042 = vmatprep.mubr.f32.mxu0 %v4250_v23 }
  0x6a   : > { %2955 = vmatmul.mubr.f32.gmra.mrb[4].mxu1 %v560_v56 }
  0x6b   : > { %3417 = vmatpush3.bf16.xpose.msra.mxu1 %v3414_v9  ;;  %2957 = vmatprep.mubr.f32.mxu1 %v570_v14  ;;  %v653_v9 = vsub.f32 %v4103_v6, %v4699_v2  ;;  %v667_v6 = vsub.f32 %v4131_v20, %v4702_v33  ;;  %v674_v14 = vsub.f32 %v4151_v42, %v4703_v57  ;;  %v4710_v2 = vand.u32 4294901760, %v4250_v23  ;;  %v305_v23 = vld [vmem:[%s4677_s2 + $0x8] sm:$0xff] }
  0x6c   : > { %3043 = vmatmul.mubr.f32.gmra.mrb[4].mxu0 %v4265_v54  ;;  %3419 = vmatprep.subr.bf16.mxu1 %v3418_v36  ;;  %v695_v42 = vsub.f32 %v4183_v16, %v4706_v8  ;;  %v4708_v16 = vand.u32 4294901760, %v4221_v11  ;;  %v308_v11 = vld [vmem:[%s4677_s2 + $0x20] sm:$0xff] }
  0x6d   : > { %3481 = vmatpush3.bf16.xpose.msra.mxu0 %v4030_v25  ;;  %3045 = vmatprep.mubr.f32.mxu0 %v4270_v58  ;;  %v654_v24 = vand.u32 4294901760, %v653_v9  ;;  %v668_v34 = vand.u32 4294901760, %v667_v6  ;;  %v675_v20 = vand.u32 4294901760, %v674_v14  ;;  %v1379_v54 = vld [vmem:[%s4679_s4] sm:$0xff]  ;;  %v1380_v58 = vld [vmem:[%s4679_s4 + $0x8] sm:$0xff]  ;;  %v1377_v9 = vld [vmem:[%s4678_s3 + $0x10] sm:$0xff] }
  0x6e   : > { %3483 = vmatprep.subr.bf16.mxu0 %v4049_v37  ;;  %2958 = vmatmul.mubr.f32.gmra.mrb[6].mxu1 %v580_v26  ;;  %v4705_v26 = vand.u32 4294901760, %v4181_v13 }
  0x6f   : > { %2992 = vmatprep.mubr.f32.mxu1 %v3998_v3  ;;  %v3426_v31 = vpack.c.bf16 %v654_v24, %v647_v22  ;;  %v3430_v56 = vpack.c.bf16 %v668_v34, %v661_v4 }
  0x70   : > { %3046 = vmatmul.mubr.f32.gmra.mrb[6].mxu0 %v4282_v44  ;;  %v688_v63 = vsub.f32 %v4181_v13, %v4705_v26  ;;  %v4707_v13 = vand.u32 4294901760, %v4217_v46  ;;  %v307_v46 = vld [vmem:[%s4677_s2 + $0x18] sm:$0xff]  ;;  %v2087_v44 = vld [vmem:[#allocation2] sm:$0x1] }
  0x71   : > { %3080 = vmatprep.mubr.f32.mxu0 %v4700_v38  ;;  %v1378_v38 = vld [vmem:[%s4678_s3 + $0x18] sm:$0xff] }
  0x72   : > { %v1414_v49 = vsel %vm1403_vm1, %v1378_v38, 0 }
  0x73   : > { %3421 = vmatpush3.bf16.xpose.msra.mxu1 %v3418_v36  ;;  %v4704_v36 = vand.u32 4294901760, %v4153_v43 }
  0x74   : > { %3423 = vmatprep.subr.bf16.mxu1 %v3422_v47 }
  0x75   : > { %3485 = vmatpush3.bf16.xpose.msra.mxu0 %v4049_v37  ;;  %v681_v19 = vsub.f32 %v4153_v43, %v4704_v36  ;;  %v689_v43 = vand.u32 4294901760, %v688_v63 }
  0x76   : > { %3487 = vmatprep.subr.bf16.mxu0 %v4075_v53 }
  0x77   : > { %v682_v17 = vand.u32 4294901760, %v681_v19  ;;  %v4492_v19 = vand.u32 4294901760, %v1414_v49 }
  0x79   : > { %v3434_v39 = vpack.c.bf16 %v682_v17, %v675_v20 }
  0x7b   : > { %3425 = vmatpush3.bf16.xpose.msra.mxu1 %v3422_v47  ;;  %v696_v47 = vand.u32 4294901760, %v695_v42 }
  0x7c   : > { %3427 = vmatprep.subr.bf16.mxu1 %v3426_v31 }
  0x7d   : > { %3489 = vmatpush3.bf16.xpose.msra.mxu0 %v4075_v53  ;;  %v3438_v48 = vpack.c.bf16 %v696_v47, %v689_v43 }
  0x7e   : > { %3491 = vmatprep.subr.bf16.mxu0 %v4113_v10 }
  0x83   : > { %3429 = vmatpush3.bf16.xpose.msra.mxu1 %v3426_v31  ;;  %v1411_v31 = vsel %vm1403_vm1, %v1377_v9, 0 }
  0x84   : > { %3431 = vmatprep.subr.bf16.mxu1 %v3430_v56  ;;  %v4487_v6 = vand.u32 4294901760, %v1411_v31 }
  0x85   : > { %3493 = vmatpush3.bf16.xpose.msra.mxu0 %v4113_v10 }
  0x86   : > { %3495 = vmatprep.subr.bf16.mxu0 %v4135_v29  ;;  %v4495_v26 = vsub.f32 %v1411_v31, %v4487_v6 }
  0x8b   : > { %3433 = vmatpush3.bf16.xpose.msra.mxu1 %v3430_v56 }
  0x8c   : > { %3435 = vmatprep.subr.bf16.mxu1 %v3434_v39 }
  0x8d   : > { %3497 = vmatpush3.bf16.xpose.msra.mxu0 %v4135_v29 }
  0x8e   : > { %3499 = vmatprep.subr.bf16.mxu0 %v4157_v50 }
  0x93   : > { %3437 = vmatpush3.bf16.xpose.msra.mxu1 %v3434_v39 }
  0x94   : > { %3439 = vmatprep.subr.bf16.mxu1 %v3438_v48 }
  0x95   : > { %3501 = vmatpush3.bf16.xpose.msra.mxu0 %v4157_v50 }
  0x96   : > { %3503 = vmatprep.subr.bf16.mxu0 %v4191_v30 }
  0x9b   : > { %3441 = vmatpush3.bf16.xpose.msra.mxu1 %v3438_v48 }
  0x9d   : > { %3505 = vmatpush3.bf16.xpose.msra.mxu0 %v4191_v30 }
  0x9e   : > { %3507 = vmatprep.subr.bf16.mxu0 %v4073_v52 }
  0xa2   : > { %2993 = vmatmul.mubr.f32.vlgmr.msra.gmra.mrb[0].mxu1 %v4186_v27 }
  0xa3   : > { %2995 = vmatprep.mubr.f32.mxu1 %v4200_v40 }
  0xa4   : > { %3081 = vmatmul.mubr.f32.vlgmr.msra.gmra.mrb[0].mxu0 %v4707_v13 }
  0xa5   : > { %3509 = vmatpush3.bf16.xpose.msra.mxu0 %v4073_v52  ;;  %3083 = vmatprep.mubr.f32.mxu0 %v4708_v16  ;;  %v304_v52 = vld [vmem:[%s4677_s2] sm:$0xff] }
  0xa6   : > { %3511 = vmatprep.subr.bf16.mxu0 %v4087_v61  ;;  %2996 = vmatmul.mubr.f32.gmra.mrb[2].mxu1 %v4209_v59 }
  0xa7   : > { %2998 = vmatprep.mubr.f32.mxu1 %v4223_v28 }
  0xa8   : > { %3084 = vmatmul.mubr.f32.gmra.mrb[2].mxu0 %v4709_v1 }
  0xa9   : > { %3086 = vmatprep.mubr.f32.mxu0 %v4710_v2  ;;  %v4499_v2 = vsub.f32 %v1414_v49, %v4492_v19 }
  0xaa   : > { %2999 = vmatmul.mubr.f32.gmra.mrb[4].mxu1 %v4241_v51 }
  0xab   : > { %3001 = vmatprep.mubr.f32.mxu1 %v4252_v35 }
  0xac   : > { %3087 = vmatmul.mubr.f32.gmra.mrb[4].mxu0 %v558_v15  ;;  %v306_v15 = vld [vmem:[%s4677_s2 + $0x10] sm:$0xff] }
  0xad   : > { %3513 = vmatpush3.bf16.xpose.msra.mxu0 %v4087_v61  ;;  %3089 = vmatprep.mubr.f32.mxu0 %v568_v45  ;;  %v3898_v61 = vmov 0   ;;  %v1381_v45 = vld [vmem:[%s4679_s4 + $0x10] sm:$0xff] }
  0xae   : > { %3515 = vmatprep.subr.bf16.mxu0 %v4094_v62  ;;  %3002 = vmatmul.mubr.f32.gmra.mrb[6].mxu1 %v4267_v55 }
  0xaf   : > { %3828 = vset.pattern.permute.xlu0 %v3898_v61  ;;  %3829 = vset.pattern.permute.xlu1 %v3898_v61 }
  0xb0   : > { %3090 = vmatmul.mubr.f32.gmra.mrb[6].mxu0 %v578_v60  ;;  %314 = vperm.xlu0 %3828, %v304_v52   ;;  %v310_v60 = vld [vmem:[%s4677_s2 + $0x30] sm:$0xff] }
  0xb1   : > { %3124 = vmatprep.mubr.f32.mxu0 %v3998_v3  ;;  %324 = vperm.xlu1 %3829, %v306_v15  }
  0xb4   : > { %319 = vperm.xlu0 %3828, %v305_v23  }
  0xb5   : > { %3517 = vmatpush3.bf16.xpose.msra.mxu0 %v4094_v62  ;;  %329 = vperm.xlu1 %3829, %v307_v46   ;;  %v311_v62 = vld [vmem:[%s4677_s2 + $0x38] sm:$0xff] }
  0xb6   : > { %3519 = vmatprep.subr.bf16.mxu0 %v4109_v7 }
  0xb8   : > { %334 = vperm.xlu0 %3828, %v308_v11  }
  0xb9   : > { %339 = vperm.xlu1 %3829, %v309_v32  }
  0xbc   : > { %344 = vperm.xlu0 %3828, %v310_v60  }
  0xbd   : > { %3521 = vmatpush3.bf16.xpose.msra.mxu0 %v4109_v7  ;;  %349 = vperm.xlu1 %3829, %v311_v62   ;;  %v1382_v7 = vld [vmem:[%s4679_s4 + $0x18] sm:$0xff]  ;;  %v1511_v62 = vand.u32 4294901760, %v4495_v26 }
  0xbe   : > { %3523 = vmatprep.subr.bf16.mxu0 %v4127_v18 }
  0xc0   : > { %1385 = vperm.xlu0 %3828, %v1379_v54  }
  0xc1   : > { %1390 = vperm.xlu1 %3829, %v1380_v58  }
  0xc4   : > { %1395 = vperm.xlu0 %3828, %v1381_v45  }
  0xc5   : > { %3525 = vmatpush3.bf16.xpose.msra.mxu0 %v4127_v18  ;;  %1400 = vperm.xlu1 %3829, %v1382_v7  }
  0xc6   : > { %3527 = vmatprep.subr.bf16.mxu0 %v4149_v41 }
  0xc8   : > { %2090 = vperm.xlu0 %3828, %v2087_v44  }
  0xcd   : > { %3529 = vmatpush3.bf16.xpose.msra.mxu0 %v4149_v41  ;;  %v1375_v41 = vld [vmem:[%s4678_s3] sm:$0xff] }
  0xce   : > { %3531 = vmatprep.subr.bf16.mxu0 %v4179_v12 }
  0xd5   : > { %3533 = vmatpush3.bf16.xpose.msra.mxu0 %v4179_v12 }
  0xd6   : > { %3535 = vmatprep.subr.bf16.mxu0 %v4230_v0 }
  0xdd   : > { %3537 = vmatpush3.bf16.xpose.msra.mxu0 %v4230_v0 }
  0xde   : > { %3539 = vmatprep.subr.bf16.mxu0 %v4022_v21 }
  0xe4   : > { %3125 = vmatmul.mubr.f32.vlgmr.msra.gmra.mrb[0].mxu0 %v4186_v27 }
  0xe5   : > { %3541 = vmatpush3.bf16.xpose.msra.mxu0 %v4022_v21  ;;  %3127 = vmatprep.mubr.f32.mxu0 %v4200_v40 }
  0xe6   : > { %3543 = vmatprep.subr.bf16.mxu0 %v4030_v25 }
  0xe8   : > { %3128 = vmatmul.mubr.f32.gmra.mrb[2].mxu0 %v4209_v59 }
  0xe9   : > { %3130 = vmatprep.mubr.f32.mxu0 %v4223_v28 }
  0xec   : > { %3131 = vmatmul.mubr.f32.gmra.mrb[4].mxu0 %v4241_v51 }
  0xed   : > { %3545 = vmatpush3.bf16.xpose.msra.mxu0 %v4030_v25  ;;  %3133 = vmatprep.mubr.f32.mxu0 %v4252_v35 }
  0xee   : > { %3547 = vmatprep.subr.bf16.mxu0 %v4049_v37 }
  0xf0   : > { %3134 = vmatmul.mubr.f32.gmra.mrb[6].mxu0 %v4267_v55 }
  0xf1   : > { %3168 = vmatprep.mubr.f32.mxu0 %v3998_v3 }
  0xf5   : > { %3549 = vmatpush3.bf16.xpose.msra.mxu0 %v4049_v37 }
  0xf6   : > { %3551 = vmatprep.subr.bf16.mxu0 %v4075_v53 }
  0xfd   : > { %3553 = vmatpush3.bf16.xpose.msra.mxu0 %v4075_v53 }
  0xfe   : > { %3555 = vmatprep.subr.bf16.mxu0 %v4113_v10 }
 0x105   : > { %3557 = vmatpush3.bf16.xpose.msra.mxu0 %v4113_v10 }
 0x106   : > { %3559 = vmatprep.subr.bf16.mxu0 %v4135_v29 }
 0x10d   : > { %3561 = vmatpush3.bf16.xpose.msra.mxu0 %v4135_v29 }
 0x10e   : > { %3563 = vmatprep.subr.bf16.mxu0 %v4157_v50 }
 0x115   : > { %3565 = vmatpush3.bf16.xpose.msra.mxu0 %v4157_v50  ;;  %v1405_v50 = vsel %vm1403_vm1, %v1375_v41, 0 }
 0x116   : > { %3567 = vmatprep.subr.bf16.mxu0 %v4191_v30  ;;  %v4464_v0 = vand.u32 4294901760, %v1405_v50 }
 0x11d   : > { %3569 = vmatpush3.bf16.xpose.msra.mxu0 %v4191_v30 }
 0x124   : > { %3169 = vmatmul.mubr.f32.vlgmr.msra.gmra.mrb[0].mxu0 %v4186_v27 }
 0x125   : > { %3171 = vmatprep.mubr.f32.mxu0 %v4200_v40 }
 0x128   : > { %3172 = vmatmul.mubr.f32.gmra.mrb[2].mxu0 %v4209_v59 }
 0x129   : > { %3174 = vmatprep.mubr.f32.mxu0 %v4223_v28  ;;  %v1376_v28 = vld [vmem:[%s4678_s3 + $0x8] sm:$0xff] }
 0x12c   : > { %3175 = vmatmul.mubr.f32.gmra.mrb[4].mxu0 %v4241_v51 }
 0x12d   : > { %3177 = vmatprep.mubr.f32.mxu0 %v4252_v35  ;;  %v4467_v35 = vsub.f32 %v1405_v50, %v4464_v0 }
 0x12f   : > { %v1491_v12 = vand.u32 4294901760, %v4467_v35  ;;  %v315_v59 = vpop.permute.xlu0 %314 }
 0x130   : > { %3178 = vmatmul.mubr.f32.gmra.mrb[6].mxu0 %v4267_v55  ;;  %v325_v40 = vpop.permute.xlu1 %324  ;;  %v1408_v55 = vsel %vm1403_vm1, %v1376_v28, 0 }
 0x131   : > { %v1492_v27 = vsub.f32 %v4467_v35, %v1491_v12  ;;  %v4483_v24 = vand.u32 4294901760, %v1408_v55 }
 0x133   : > { %v1493_v30 = vand.u32 4294901760, %v1492_v27  ;;  %v320_v22 = vpop.permute.xlu0 %319  ;;  %v4490_v57 = vsub.f32 %v1408_v55, %v4483_v24 }
 0x134   : > { %v330_v51 = vpop.permute.xlu1 %329 }
 0x135   : > { %3196 = vmatprep.mubr.f32.mxu1 %v1493_v30  ;;  %v1501_v43 = vand.u32 4294901760, %v4490_v57 }
 0x137   : > { %v335_v34 = vpop.permute.xlu0 %334  ;;  %v4507_v44 = vsub.f32 %v4490_v57, %v1501_v43 }
 0x138   : > { %v340_v33 = vpop.permute.xlu1 %339 }
 0x13b   : > { %v345_v52 = vpop.permute.xlu0 %344 }
 0x13c   : > { %v350_v48 = vpop.permute.xlu1 %349 }
 0x175   : > { %v2994_v3 = vpop.f32.mrb[0].mxu1 }
 0x176   : > { %v733_v21 = vpop.f32.mrb[1].mxu1  ;;  %v3702_v5 = vadd.f32 %v2994_v3, %v320_v22 }
 0x177   : > { %v3704_v4 = vadd.f32 %v733_v21, %v315_v59 }
 0x179   : > { %v2997_v25 = vpop.f32.mrb[2].mxu1 }
 0x17a   : > { %v745_v37 = vpop.f32.mrb[3].mxu1  ;;  %v3706_v17 = vadd.f32 %v2997_v25, %v330_v51 }
 0x17b   : > { %v3708_v63 = vadd.f32 %v745_v37, %v325_v40  ;;  %v4517_v40 = vsub.f32 %v4495_v26, %v1511_v62 }
 0x17d   : > { %v3000_v53 = vpop.f32.mrb[4].mxu1 }
 0x17e   : > { %v757_v10 = vpop.f32.mrb[5].mxu1  ;;  %v3710_v47 = vadd.f32 %v3000_v53, %v340_v33  ;;  %v1521_v53 = vand.u32 4294901760, %v4499_v2 }
 0x17f   : > { %v3712_v15 = vadd.f32 %v757_v10, %v335_v34 }
 0x181   : > { %v3003_v18 = vpop.f32.mrb[6].mxu1 }
 0x182   : > { %v769_v29 = vpop.f32.mrb[7].mxu1  ;;  %v3714_v61 = vadd.f32 %v3003_v18, %v350_v48 }
 0x183   : > { %v3716_v11 = vadd.f32 %v769_v29, %v345_v52 }
 0x1f7   : > { %v3170_v56 = vpop.f32.mrb[0].mxu0 }
 0x1f8   : > { %v3703_v14 = vadd.f32 %v3702_v5, %v3170_v56  ;;  %v1321_v36 = vpop.f32.mrb[1].mxu0 }
 0x1f9   : > { %v3705_v20 = vadd.f32 %v3704_v4, %v1321_v36 }
 0x1fa   : > { %v1368_v39 = vmax.f32 %v3703_v14, 0.0 }
 0x1fb   : > { %v1367_v8 = vmax.f32 %v3705_v20, 0.0  ;;  %v3173_v42 = vpop.f32.mrb[2].mxu0 }
 0x1fc   : > { %v1420_v13 = vand.u32 4294901760, %v1368_v39  ;;  %v3707_v16 = vadd.f32 %v3706_v17, %v3173_v42  ;;  %v1333_v1 = vpop.f32.mrb[3].mxu0 }
 0x1fd   : > { %v1417_v23 = vand.u32 4294901760, %v1367_v8  ;;  %v3709_v46 = vadd.f32 %v3708_v63, %v1333_v1 }
 0x1fe   : > { %v1538_v32 = vsub.f32 %v1368_v39, %v1420_v13  ;;  %v1370_v60 = vmax.f32 %v3707_v16, 0.0 }
 0x1ff   : > { %v4502_v54 = vpack.c.bf16 %v1420_v13, %v1417_v23  ;;  %v1531_v58 = vsub.f32 %v1367_v8, %v1417_v23  ;;  %v1369_v45 = vmax.f32 %v3709_v46, 0.0  ;;  %v3176_v7 = vpop.f32.mrb[4].mxu0 }
 0x200   : > { %v1539_v3 = vand.u32 4294901760, %v1538_v32  ;;  %v1426_v21 = vand.u32 4294901760, %v1370_v60  ;;  %v3711_v25 = vadd.f32 %v3710_v47, %v3176_v7  ;;  %v1345_v37 = vpop.f32.mrb[5].mxu0 }
 0x201   : > { %v1532_v10 = vand.u32 4294901760, %v1531_v58  ;;  %v1423_v18 = vand.u32 4294901760, %v1369_v45  ;;  %v3713_v29 = vadd.f32 %v3712_v15, %v1345_v37  ;;  %3571 = vmatprep.subr.bf16.mxu1 %v4502_v54  ;;  %v4511_v41 = vpack.c.bf16 %v1538_v32, %v1531_v58 }
 0x202   : > { %v1552_v50 = vsub.f32 %v1370_v60, %v1426_v21  ;;  %v1372_v27 = vmax.f32 %v3711_v25, 0.0  ;;  %3573 = vmatpush3.bf16.msra.mxu1 %v4502_v54  ;;  %v1540_v30 = vsub.f32 %v1538_v32, %v1539_v3  ;;  %v1503_v25 = vand.u32 4294901760, %v4507_v44 }
 0x203   : > { %v4519_v59 = vpack.c.bf16 %v1426_v21, %v1423_v18  ;;  %v1545_v28 = vsub.f32 %v1369_v45, %v1423_v18  ;;  %v1371_v51 = vmax.f32 %v3713_v29, 0.0  ;;  %v3179_v55 = vpop.f32.mrb[6].mxu0  ;;  %v1533_v9 = vsub.f32 %v1531_v58, %v1532_v10 }
 0x204   : > { %v1553_v38 = vand.u32 4294901760, %v1552_v50  ;;  %v1432_v22 = vand.u32 4294901760, %v1372_v27  ;;  %v3715_v31 = vadd.f32 %v3714_v61, %v3179_v55  ;;  %v1357_v49 = vpop.f32.mrb[7].mxu0  ;;  %v1541_v5 = vand.u32 4294901760, %v1540_v30 }
 0x205   : > { %v1546_v33 = vand.u32 4294901760, %v1545_v28  ;;  %v1429_v4 = vand.u32 4294901760, %v1371_v51  ;;  %v3717_v34 = vadd.f32 %v3716_v11, %v1357_v49  ;;  %3575 = vmatprep.subr.bf16.mxu1 %v4519_v59  ;;  %v1534_v56 = vand.u32 4294901760, %v1533_v9 }
 0x206   : > { %v1566_v14 = vsub.f32 %v1372_v27, %v1432_v22  ;;  %v1374_v36 = vmax.f32 %v3715_v31, 0.0  ;;  %3577 = vmatpush3.bf16.msra.mxu1 %v4519_v59  ;;  %v1554_v20 = vsub.f32 %v1552_v50, %v1553_v38  ;;  %v3606_v17 = vpack.c.bf16 %v1552_v50, %v1545_v28 }
 0x207   : > { %v4523_v39 = vpack.c.bf16 %v1432_v22, %v1429_v4  ;;  %v1559_v63 = vsub.f32 %v1371_v51, %v1429_v4  ;;  %v1373_v8 = vmax.f32 %v3717_v34, 0.0  ;;  %v3586_v42 = vpack.c.bf16 %v1541_v5, %v1534_v56 }
 0x208   : > { %v1567_v47 = vand.u32 4294901760, %v1566_v14  ;;  %v1438_v48 = vand.u32 4294901760, %v1374_v36  ;;  %v1547_v13 = vsub.f32 %v1545_v28, %v1546_v33  ;;  %v1555_v16 = vand.u32 4294901760, %v1554_v20 }
 0x209   : > { %v1560_v1 = vand.u32 4294901760, %v1559_v63  ;;  %v1435_v52 = vand.u32 4294901760, %v1373_v8  ;;  %3579 = vmatprep.subr.bf16.mxu1 %v4523_v39  ;;  %v3610_v15 = vpack.c.bf16 %v1566_v14, %v1559_v63  ;;  %v4526_v61 = vpack.c.bf16 %v1539_v3, %v1532_v10 }
 0x20a   : > { %v1580_v23 = vsub.f32 %v1374_v36, %v1438_v48  ;;  %3581 = vmatpush3.bf16.msra.mxu1 %v4523_v39  ;;  %v1548_v46 = vand.u32 4294901760, %v1547_v13  ;;  %v1568_v11 = vsub.f32 %v1566_v14, %v1567_v47  ;;  %v4529_v32 = vpack.c.bf16 %v1553_v38, %v1546_v33 }
 0x20b   : > { %v4531_v60 = vpack.c.bf16 %v1438_v48, %v1435_v52  ;;  %v1573_v58 = vsub.f32 %v1373_v8, %v1435_v52  ;;  %v1561_v45 = vsub.f32 %v1559_v63, %v1560_v1  ;;  %v4533_v7 = vpack.c.bf16 %v1567_v47, %v1560_v1 }
 0x20c   : > { %v1581_v21 = vand.u32 4294901760, %v1580_v23  ;;  %v3590_v37 = vpack.c.bf16 %v1555_v16, %v1548_v46  ;;  %v1569_v18 = vand.u32 4294901760, %v1568_v11  ;;  %v1522_v29 = vsub.f32 %v4499_v2, %v1521_v53 }
 0x20d   : > { %v1574_v3 = vand.u32 4294901760, %v1573_v58  ;;  %3583 = vmatprep.subr.bf16.mxu1 %v4531_v60  ;;  %v1562_v10 = vand.u32 4294901760, %v1561_v45  ;;  %v3614_v50 = vpack.c.bf16 %v1580_v23, %v1573_v58  ;;  %v1513_v30 = vand.u32 4294901760, %v4517_v40 }
 0x20e   : > { %3585 = vmatpush3.bf16.msra.mxu1 %v4531_v60  ;;  %v1582_v27 = vsub.f32 %v1580_v23, %v1581_v21  ;;  %v1523_v38 = vand.u32 4294901760, %v1522_v29  ;;  %v2093_v29 = vlaneseq }
 0x20f   : > { %3587 = vmatprep.subr.bf16.mxu1 %v3586_v42  ;;  %v3594_v28 = vpack.c.bf16 %v1569_v18, %v1562_v10  ;;  %v1575_v51 = vsub.f32 %v1573_v58, %v1574_v3  ;;  %v3646_v44 = vpack.c.bf16 %v1581_v21, %v1574_v3 }
 0x210   : > { %v1583_v55 = vand.u32 4294901760, %v1582_v27 }
 0x211   : > { %3197 = vmatmul.mubr.f32.vlgmr.msra.gmra.mrb[8].mxu1 %v1503_v25  ;;  %v1576_v9 = vand.u32 4294901760, %v1575_v51 }
 0x212   : > { %3589 = vmatpush3.bf16.msra.mxu1 %v3586_v42  ;;  %3199 = vmatprep.mubr.f32.mxu1 %v1513_v30 }
 0x213   : > { %3591 = vmatprep.subr.bf16.mxu1 %v3590_v37  ;;  %v3598_v22 = vpack.c.bf16 %v1583_v55, %v1576_v9 }
 0x215   : > { %3200 = vmatmul.mubr.f32.gmra.mrb[10].mxu1 %v1523_v38 }
 0x216   : > { %3593 = vmatpush3.bf16.msra.mxu1 %v3590_v37  ;;  %3218 = vmatprep.mubr.f32.mxu1 %v4464_v0 }
 0x217   : > { %3595 = vmatprep.subr.bf16.mxu1 %v3594_v28 }
 0x21a   : > { %3597 = vmatpush3.bf16.msra.mxu1 %v3594_v28 }
 0x21b   : > { %3599 = vmatprep.subr.bf16.mxu1 %v3598_v22 }
 0x21e   : > { %3601 = vmatpush3.bf16.msra.mxu1 %v3598_v22 }
 0x21f   : > { %3603 = vmatprep.subr.bf16.mxu1 %v4511_v41 }
 0x221   : > { %3219 = vmatmul.mubr.f32.vlgmr.msra.gmra.mrb[8].mxu1 %v4483_v24 }
 0x222   : > { %3605 = vmatpush3.bf16.msra.mxu1 %v4511_v41  ;;  %3221 = vmatprep.mubr.f32.mxu1 %v4487_v6 }
 0x223   : > { %3607 = vmatprep.subr.bf16.mxu1 %v3606_v17 }
 0x225   : > { %3222 = vmatmul.mubr.f32.gmra.mrb[10].mxu1 %v4492_v19 }
 0x226   : > { %3609 = vmatpush3.bf16.msra.mxu1 %v3606_v17  ;;  %3240 = vmatprep.mubr.f32.mxu1 %v4467_v35  ;;  %v3899_v35 = vmov 0.0|0.0  }
 0x227   : > { %3611 = vmatprep.subr.bf16.mxu1 %v3610_v15 }
 0x22a   : > { %3613 = vmatpush3.bf16.msra.mxu1 %v3610_v15 }
 0x22b   : > { %3615 = vmatprep.subr.bf16.mxu1 %v3614_v50 }
 0x22e   : > { %3617 = vmatpush3.bf16.msra.mxu1 %v3614_v50  ;;  %v2094_v50 = vshrl.u32 %v2093_v29, 7 }
 0x22f   : > { %3619 = vmatprep.subr.bf16.mxu1 %v4502_v54 }
 0x230   : > { %v2095_v27 = vsub.s32 0, %v2094_v50 }
 0x231   : > { %3241 = vmatmul.mubr.f32.vlgmr.msra.gmra.mrb[8].mxu1 %v4490_v57 }
 0x232   : > { %3621 = vmatpush3.bf16.msra.mxu1 %v4502_v54  ;;  %3243 = vmatprep.mubr.f32.mxu1 %v4495_v26 }
 0x233   : > { %3623 = vmatprep.subr.bf16.mxu1 %v4519_v59 }
 0x235   : > { %3244 = vmatmul.mubr.f32.gmra.mrb[10].mxu1 %v4499_v2 }
 0x236   : > { %3625 = vmatpush3.bf16.msra.mxu1 %v4519_v59  ;;  %3262 = vmatprep.mubr.f32.mxu1 %v1491_v12  ;;  %v3901_v12 = vmov 0.0  }
 0x237   : > { %3627 = vmatprep.subr.bf16.mxu1 %v4523_v39 }
 0x23a   : > { %3629 = vmatpush3.bf16.msra.mxu1 %v4523_v39 }
 0x23b   : > { %3631 = vmatprep.subr.bf16.mxu1 %v4531_v60 }
 0x23e   : > { %3633 = vmatpush3.bf16.msra.mxu1 %v4531_v60 }
 0x23f   : > { %3635 = vmatprep.subr.bf16.mxu1 %v4526_v61 }
 0x241   : > { %3263 = vmatmul.mubr.f32.vlgmr.msra.gmra.mrb[8].mxu1 %v1501_v43 }
 0x242   : > { %3637 = vmatpush3.bf16.msra.mxu1 %v4526_v61  ;;  %3265 = vmatprep.mubr.f32.mxu1 %v1511_v62 }
 0x243   : > { %3639 = vmatprep.subr.bf16.mxu1 %v4529_v32 }
 0x245   : > { %3266 = vmatmul.mubr.f32.gmra.mrb[10].mxu1 %v1521_v53 }
 0x246   : > { %3641 = vmatpush3.bf16.msra.mxu1 %v4529_v32  ;;  %3284 = vmatprep.mubr.f32.mxu1 %v4464_v0 }
 0x247   : > { %3643 = vmatprep.subr.bf16.mxu1 %v4533_v7 }
 0x24a   : > { %3645 = vmatpush3.bf16.msra.mxu1 %v4533_v7 }
 0x24b   : > { %3647 = vmatprep.subr.bf16.mxu1 %v3646_v44 }
 0x24e   : > { %3649 = vmatpush3.bf16.msra.mxu1 %v3646_v44 }
 0x24f   : > { %3651 = vmatprep.subr.bf16.mxu1 %v4502_v54 }
 0x251   : > { %3285 = vmatmul.mubr.f32.vlgmr.msra.gmra.mrb[8].mxu1 %v4483_v24 }
 0x252   : > { %3653 = vmatpush3.bf16.msra.mxu1 %v4502_v54  ;;  %3287 = vmatprep.mubr.f32.mxu1 %v4487_v6 }
 0x253   : > { %3655 = vmatprep.subr.bf16.mxu1 %v4519_v59 }
 0x255   : > { %3288 = vmatmul.mubr.f32.gmra.mrb[10].mxu1 %v4492_v19 }
 0x256   : > { %3657 = vmatpush3.bf16.msra.mxu1 %v4519_v59  ;;  %3306 = vmatprep.mubr.f32.mxu1 %v4464_v0  ;;  %v2086_v0 = vld [vmem:[%s4680_s5] sm:$0x1] }
 0x257   : > { %3659 = vmatprep.subr.bf16.mxu1 %v4523_v39  ;;  %v2099_v57 = vsel %vm2097_vm3, %v2086_v0, 0 }
 0x258   : > { %v4596_v26 = vand.u32 4294901760, %v2099_v57 }
 0x25a   : > { %3661 = vmatpush3.bf16.msra.mxu1 %v4523_v39  ;;  %v4599_v62 = vsub.f32 %v2099_v57, %v4596_v26 }
 0x25b   : > { %3663 = vmatprep.subr.bf16.mxu1 %v4531_v60 }
 0x25c   : > { %v2172_v4 = vand.u32 4294901760, %v4599_v62 }
 0x25e   : > { %3665 = vmatpush3.bf16.msra.mxu1 %v4531_v60  ;;  %v2173_v42 = vsub.f32 %v4599_v62, %v2172_v4 }
 0x25f   : > { %3666 = vmatprep.subr.bf16.mxu1 %v3899_v35 }
 0x260   : > { %v2174_v32 = vand.u32 4294901760, %v2173_v42 }
 0x261   : > { %3307 = vmatmul.mubr.f32.vlgmr.msra.gmra.mrb[8].mxu1 %v4483_v24  ;;  %v1391_v24 = vpop.permute.xlu1 %1390 }
 0x262   : > { %3309 = vmatprep.mubr.f32.mxu1 %v4487_v6  ;;  %v1386_v6 = vpop.permute.xlu0 %1385 }
 0x265   : > { %3310 = vmatmul.mubr.f32.gmra.mrb[10].mxu1 %v4492_v19  ;;  %v1401_v41 = vpop.permute.xlu1 %1400 }
 0x266   : > { %3320 = vmatprep.mubr.msk.f32.mxu1 %vm3900_vm2, %v3901_v12  ;;  %v1396_v31 = vpop.permute.xlu0 %1395 }
 0x26a   : > { %v2091_v30 = vpop.permute.xlu0 %2090 }
 0x26b   : > { %v2096_v28 = vrot.slane %v2091_v30, %v2095_v27 }
 0x334   : > { %v3308_v43 = vpop.f32.mrb[8].mxu1 }
 0x335   : > { %v3718_v19 = vadd.f32 %v3308_v43, %v1391_v24  ;;  %v2060_v2 = vpop.f32.mrb[9].mxu1 }
 0x336   : > { %v3719_v54 = vadd.f32 %v2060_v2, %v1386_v6 }
 0x337   : > { %v2083_v53 = vmax.f32 %v3718_v19, 0.0 }
 0x338   : > { %v2082_v40 = vmax.f32 %v3719_v54, 0.0  ;;  %v3311_v59 = vpop.f32.mrb[10].mxu1 }
 0x339   : > { %v2105_v49 = vand.u32 4294901760, %v2083_v53  ;;  %v3720_v5 = vadd.f32 %v3311_v59, %v1401_v41  ;;  %v2072_v33 = vpop.f32.mrb[11].mxu1 }
 0x33a   : > { %v2102_v34 = vand.u32 4294901760, %v2082_v40  ;;  %v3721_v56 = vadd.f32 %v2072_v33, %v1396_v31 }
 0x33b   : > { %v2189_v14 = vsub.f32 %v2083_v53, %v2105_v49  ;;  %v2085_v36 = vmax.f32 %v3720_v5, 0.0 }
 0x33c   : > { %v3667_v20 = vpack.c.bf16 %v2105_v49, %v2102_v34  ;;  %v2182_v17 = vsub.f32 %v2082_v40, %v2102_v34  ;;  %v2084_v39 = vmax.f32 %v3721_v56, 0.0 }
 0x33d   : > { %v2190_v63 = vand.u32 4294901760, %v2189_v14  ;;  %v2111_v8 = vand.u32 4294901760, %v2085_v36 }
 0x33e   : > { %v2183_v47 = vand.u32 4294901760, %v2182_v17  ;;  %v2108_v48 = vand.u32 4294901760, %v2084_v39  ;;  %3668 = vmatpush3.bf16.msra.mxu1 %v3667_v20  ;;  %v3679_v13 = vpack.c.bf16 %v2189_v14, %v2182_v17 }
 0x33f   : > { %v2191_v16 = vsub.f32 %v2189_v14, %v2190_v63  ;;  %v2203_v1 = vsub.f32 %v2085_v36, %v2111_v8  ;;  %3669 = vmatprep.subr.bf16.mxu1 %v3899_v35 }
 0x340   : > { %v2184_v52 = vsub.f32 %v2182_v17, %v2183_v47  ;;  %v3670_v15 = vpack.c.bf16 %v2111_v8, %v2108_v48  ;;  %v2196_v61 = vsub.f32 %v2084_v39, %v2108_v48  ;;  %v3691_v23 = vpack.c.bf16 %v2190_v63, %v2183_v47 }
 0x341   : > { %v2192_v46 = vand.u32 4294901760, %v2191_v16  ;;  %v2204_v11 = vand.u32 4294901760, %v2203_v1 }
 0x342   : > { %v2185_v60 = vand.u32 4294901760, %v2184_v52  ;;  %v2197_v58 = vand.u32 4294901760, %v2196_v61  ;;  %3671 = vmatpush3.bf16.msra.mxu1 %v3670_v15  ;;  %v3682_v45 = vpack.c.bf16 %v2203_v1, %v2196_v61 }
 0x343   : > { %v2205_v7 = vsub.f32 %v2203_v1, %v2204_v11  ;;  %3672 = vmatprep.subr.bf16.mxu1 %v3899_v35 }
 0x344   : > { %v2198_v21 = vsub.f32 %v2196_v61, %v2197_v58  ;;  %v3673_v25 = vpack.c.bf16 %v2192_v46, %v2185_v60  ;;  %v3694_v37 = vpack.c.bf16 %v2204_v11, %v2197_v58 }
 0x345   : > { %v2206_v18 = vand.u32 4294901760, %v2205_v7  ;;  %3321 = vmatmul.mubr.f32.vlgmr.msra.gmra.mrb[12].mxu1 %v2174_v32 }
 0x346   : > { %v2199_v3 = vand.u32 4294901760, %v2198_v21  ;;  %3674 = vmatpush3.bf16.msra.mxu1 %v3673_v25  ;;  %3331 = vmatprep.mubr.msk.f32.mxu1 %vm3900_vm2, %v3901_v12 }
 0x347   : > { %3675 = vmatprep.subr.bf16.mxu1 %v3899_v35 }
 0x348   : > { %v3676_v10 = vpack.c.bf16 %v2206_v18, %v2199_v3 }
 0x34a   : > { %3677 = vmatpush3.bf16.msra.mxu1 %v3676_v10 }
 0x34b   : > { %3678 = vmatprep.subr.bf16.mxu1 %v3899_v35 }
 0x34d   : > { %3332 = vmatmul.mubr.f32.vlgmr.msra.gmra.mrb[12].mxu1 %v4596_v26 }
 0x34e   : > { %3680 = vmatpush3.bf16.msra.mxu1 %v3679_v13  ;;  %3342 = vmatprep.mubr.msk.f32.mxu1 %vm3900_vm2, %v3901_v12 }
 0x34f   : > { %3681 = vmatprep.subr.bf16.mxu1 %v3899_v35 }
 0x352   : > { %3683 = vmatpush3.bf16.msra.mxu1 %v3682_v45 }
 0x353   : > { %3684 = vmatprep.subr.bf16.mxu1 %v3899_v35 }
 0x355   : > { %3343 = vmatmul.mubr.f32.vlgmr.msra.gmra.mrb[12].mxu1 %v4599_v62 }
 0x356   : > { %3686 = vmatpush3.bf16.msra.mxu1 %v3667_v20  ;;  %3353 = vmatprep.mubr.msk.f32.mxu1 %vm3900_vm2, %v3901_v12 }
 0x357   : > { %3687 = vmatprep.subr.bf16.mxu1 %v3899_v35 }
 0x35a   : > { %3689 = vmatpush3.bf16.msra.mxu1 %v3670_v15 }
 0x35b   : > { %3690 = vmatprep.subr.bf16.mxu1 %v3899_v35 }
 0x35d   : > { %3354 = vmatmul.mubr.f32.vlgmr.msra.gmra.mrb[12].mxu1 %v2172_v4 }
 0x35e   : > { %3692 = vmatpush3.bf16.msra.mxu1 %v3691_v23  ;;  %3364 = vmatprep.mubr.msk.f32.mxu1 %vm3900_vm2, %v3901_v12 }
 0x35f   : > { %3693 = vmatprep.subr.bf16.mxu1 %v3899_v35 }
 0x362   : > { %3695 = vmatpush3.bf16.msra.mxu1 %v3694_v37 }
 0x363   : > { %3696 = vmatprep.subr.bf16.mxu1 %v3899_v35 }
 0x365   : > { %3365 = vmatmul.mubr.f32.vlgmr.msra.gmra.mrb[12].mxu1 %v4596_v26 }
 0x366   : > { %3698 = vmatpush3.bf16.msra.mxu1 %v3667_v20  ;;  %3375 = vmatprep.mubr.msk.f32.mxu1 %vm3900_vm2, %v3901_v12 }
 0x367   : > { %3699 = vmatprep.subr.bf16.mxu1 %v3899_v35 }
 0x36a   : > { %3701 = vmatpush3.bf16.msra.mxu1 %v3670_v15 }
 0x36d   : > { %3376 = vmatmul.mubr.f32.vlgmr.msra.gmra.mrb[12].mxu1 %v4596_v26 }
 0x440   : > { %v2582_v51 = vpop.f32.mrb[12].mxu1 }
 0x441   : > { %v3722_v44 = vadd.f32 %v2582_v51, %v2096_v28  ;;  %v3377_v55 = vpop.f32.mrb[13].mxu1 }
 0x443   : > { %v2586_v9 = vsub.f32 0.0, %v3722_v44 }
 0x445   : > { %v2587_v38 = vmul.f32 1.442695, %v2586_v9 }
 0x447   : > { %3830 = vpow2.f32 %v2587_v38 }
 0x451   : > { %v3831_v22 = vpop.eup %3830 }
 0x452   : > { %v2589_v12 = vadd.f32 1.0, %v3831_v22 }
 0x454   : > { %3832 = vrcp.f32 %v2589_v12 }
 0x45e   : > { %v3833_v35 = vpop.eup %3832 }
 0x45f   : > { %2592 = vst [vmem:[%s273_s6] sm:$0x1] %v3833_v35 }
 0x460   : > { %3847 = shalt.err (!%p3844_p3)
}
 0x461   : > { %s3848_s14 = scalar_lea.hbm %s4633_s15, 16  ;;  %s3852_s23 = scalar_lea.hbm %s4682_s7, 32 }
 0x462   : > { %p3849_p4 = scmp.ne.s32.totalorder %s4633_s15, %s3848_s14  ;;  %p3853_p9 = scmp.lt.u32.totalorder %s4633_s15, %s4682_s7 }
 0x463   : > { %p3854_p10 = scmp.lt.u32.totalorder %s3852_s23, %s3848_s14  ;;  %p3856_p12 = scmp.lt.u32.totalorder %s3848_s14, %s4633_s15 }
 0x464   : > { %p3850_p7 = pnand %p3849_p4, %p3981_p5 }
 0x465   : > { %p3855_p11 = por %p3854_p10, %p3853_p9 }
 0x466   : > { %p3851_p8 = pneg %p3850_p7 }
 0x467   : > { %p3857_p13 = por %p3856_p12, %p3855_p11 }
 0x469   : > { %p3858_p0 = pnand %p3857_p13, %p3851_p8 }
 0x46b   : > { %3861 = shalt.err (!%p3858_p0)
}
 0x46c   : > { %3785 = dma.vmem_to_hbm [thread:$0]  (%p3981_p5), %s4635_s30, 16, %s4633_s15, %s2594_s16  }
 0x46d PF: > { %p3791_p1 = scmp.ge.s32.totalorder %s3896_s29, 2  ;;  %s2618_s6 = sand.u32 1, %s3884_s26  }
 0x46e   : > { %s2619_s9 = scalar_lea.sflag [#allocation4], %s2618_s6 }
 0x46f   : > { %p3788_p2 = pnand %p3791_p1, %p3985_p6 }
 0x471   : > { %3879 = dma.done.wait (!%p3788_p2), %s2619_s9, 16  }
 0x472   : > { %3881 = vsyncadd (!%p3788_p2), %s2619_s9, 4294967280  ;;  %p19_p3 = scmp.ge.s32.totalorder %s3969_s8, 4   ;;  %s4711_s26 = smov %s3888_s27 }
 0x473   : > { %s4712_s27 = smov %s3892_s28  ;;  %s4713_s28 = smov %s3979_s11 }
 0x474   : > { %s4714_s29 = smov %s3969_s8  ;;  %21 = sbr.rel (!%p19_p3) target bundleno = 6 (0x6), region = 83 }
 0x47b   :  { %2623 = vsyncpa [#allocation4], 1 }
 0x47c   :  { %2625 = vsyncpa [#allocation4 + $0x1], 1 }

</bundles_post_ra>
